<compile_context>
chip_gen: v6e
topology: v6e:2x2x1
jax: 0.10.0
libtpu: 0.0.40
codegen_flags: <defaults>
</compile_context>

<pallas_src>
import math

import jax
import jax.numpy as jnp
from jax.experimental import pallas as pl
from jax.experimental.pallas import tpu as pltpu

BN_EPS = 1e-5


def _round_up(x, m):
    return ((x + m - 1) // m) * m


# --------------------------- Pallas kernel -----------------------------------

def _transition_kernel(x_ref, scale_ref, bias_ref, w_ref, o_ref):
    """Fused BN + ReLU + 1x1 conv + (1,2) avg pool.

    x_ref:     (TM, 2*Cin_p)   two adjacent W positions per row, channels last
    scale_ref: (1,  2*Cin_p)   folded BN scale, duplicated for both W positions
    bias_ref:  (1,  2*Cin_p)   folded BN bias,  duplicated for both W positions
    w_ref:     (2*Cin_p, Cout_p)  0.5 * [Wconv; Wconv]  (pool fused in weights)
    o_ref:     (TM, Cout_p)
    """
    y = jnp.maximum(x_ref[...] * scale_ref[...] + bias_ref[...], 0.0)
    o_ref[...] = jnp.dot(y, w_ref[...], preferred_element_type=jnp.float32)


# --------------------------- wrapper ------------------------------------------

def transition_forward(x, params, *, training=False, tm=None):
    """x: (B, Cin, H, W) float32 (NCHW, like the PyTorch module).
       Returns (B, Cout, H, W//2) float32."""
    B, C, H, W = x.shape
    gamma, beta, run_mean, run_var = params['bn']
    w = params['conv_w']                                   # (Cin, Cout)
    Cout = w.shape[1]

    if training:
        mean = jnp.mean(x, axis=(0, 2, 3))
        var = jnp.var(x, axis=(0, 2, 3))                   # biased, as in PyTorch fwd
    else:
        mean, var = run_mean, run_var
    scale = gamma / jnp.sqrt(var + BN_EPS)
    bias = beta - mean * scale

    Wout = W // 2                                          # avg_pool2d floor mode
    We = Wout * 2
    Cin_p = _round_up(C, 128)
    Cout_p = _round_up(Cout, 128)

    # channels-last, drop odd trailing column, pad channels to 128 lanes
    xcl = jnp.transpose(x[:, :, :, :We], (0, 2, 3, 1))     # (B, H, We, C)
    xcl = jnp.pad(xcl, ((0, 0), (0, 0), (0, 0), (0, Cin_p - C)))

    # fold the (1,2) pool pair into the contraction axis: row = [x(2w), x(2w+1)]
    M = B * H * Wout
    xm = xcl.reshape(M, 2 * Cin_p).astype(jnp.float32)

    if tm is None:
        tm = _round_up(max(M, 1), 8) if M <= 1024 else 512
    Mp = _round_up(max(M, 1), tm)
    xm = jnp.pad(xm, ((0, Mp - M), (0, 0)))

    sp = jnp.pad(scale.astype(jnp.float32), (0, Cin_p - C))
    bp = jnp.pad(bias.astype(jnp.float32), (0, Cin_p - C))
    scale2 = jnp.tile(sp, 2).reshape(1, 2 * Cin_p)
    bias2 = jnp.tile(bp, 2).reshape(1, 2 * Cin_p)

    wp = jnp.pad(w.astype(jnp.float32), ((0, Cin_p - C), (0, Cout_p - Cout)))
    wmat = 0.5 * jnp.concatenate([wp, wp], axis=0)         # (2*Cin_p, Cout_p)

    out = pl.pallas_call(
        _transition_kernel,
        out_shape=jax.ShapeDtypeStruct((Mp, Cout_p), jnp.float32),
        grid=(Mp // tm,),
        in_specs=[
            pl.BlockSpec((tm, 2 * Cin_p), lambda i: (i, 0)),
            pl.BlockSpec((1, 2 * Cin_p), lambda i: (0, 0)),
            pl.BlockSpec((1, 2 * Cin_p), lambda i: (0, 0)),
            pl.BlockSpec((2 * Cin_p, Cout_p), lambda i: (0, 0)),
        ],
        out_specs=pl.BlockSpec((tm, Cout_p), lambda i: (i, 0)),
        compiler_params=pltpu.CompilerParams(
            dimension_semantics=("parallel",)),
    )(xm, scale2, bias2, wmat)

    out = out[:M, :Cout].reshape(B, H, Wout, Cout)         # strip padding
    return jnp.transpose(out, (0, 3, 1, 2))                # (B, Cout, H, Wout)


# --------------------------- reference (pure JAX) -----------------------------

def transition_ref(x, params, *, training=False):
    gamma, beta, run_mean, run_var = params['bn']
    if training:
        mean = jnp.mean(x, axis=(0, 2, 3))
        var = jnp.var(x, axis=(0, 2, 3))
    else:
        mean, var = run_mean, run_var
    scale = gamma / jnp.sqrt(var + BN_EPS)
    bias = beta - mean * scale
    y = jnp.maximum(x * scale[None, :, None, None] + bias[None, :, None, None], 0.0)
    z = jnp.einsum('bchw,cd->bdhw', y, params['conv_w'],
                   precision=jax.lax.Precision.HIGHEST)
    We = (z.shape[-1] // 2) * 2
    return 0.5 * (z[..., 0:We:2] + z[..., 1:We:2])


# --------------------------- parameters ---------------------------------------

def init_params(key, nChannels, nOutChannels):
    kw, kg, kb, km, kv = jax.random.split(key, 5)
    # densenet.py init: normal(0, sqrt(2/n)), n = kh*kw*nOutChannels with kh=kw=1
    w = (jax.random.normal(kw, (nChannels, nOutChannels), jnp.float32)
         * math.sqrt(2.0 / nOutChannels))
    gamma = 1.0 + 0.1 * jax.random.normal(kg, (nChannels,), jnp.float32)
    beta = 0.1 * jax.random.normal(kb, (nChannels,), jnp.float32)
    run_mean = 0.1 * jax.random.normal(km, (nChannels,), jnp.float32)
    run_var = 1.0 + 0.1 * jax.random.uniform(kv, (nChannels,), jnp.float32)
    return dict(conv_w=w, bn=(gamma, beta, run_mean, run_var))


# --------------------------- main ----------------------------------------------

if __name__ == "__main__":
    key = jax.random.PRNGKey(0)
    k1, k2, k3, k4 = jax.random.split(key, 4)

    # Transition(nChannels=108, nOutChannels=54) as used after dense block 1.
    p1 = init_params(k1, 108, 54)
    x1 = jax.random.normal(k2, (2, 108, 4, 32), jnp.float32)
    f1 = jax.jit(lambda xx: transition_forward(xx, p1, training=False))
    o1 = jax.block_until_ready(f1(x1))
    r1 = transition_ref(x1, p1, training=False)
    assert o1.shape == (2, 54, 4, 16), o1.shape
    assert bool(jnp.all(jnp.isfinite(o1)))
    assert bool(jnp.allclose(o1, r1, atol=2e-2, rtol=2e-2))

    # Transition(138 -> 69), odd width (floor-mode pool), training-mode batch stats.
    p2 = init_params(k3, 138, 69)
    x2 = jax.random.normal(k4, (2, 138, 4, 33), jnp.float32)
    f2 = jax.jit(lambda xx: transition_forward(xx, p2, training=True))
    o2 = jax.block_until_ready(f2(x2))
    r2 = transition_ref(x2, p2, training=True)
    assert o2.shape == (2, 69, 4, 16), o2.shape
    assert bool(jnp.all(jnp.isfinite(o2)))
    assert bool(jnp.allclose(o2, r2, atol=2e-2, rtol=2e-2))

    print("KERNEL_OK")
</pallas_src>

<mosaic_0001>
module attributes {stable_mosaic.version = 11 : i64} {
  func.func @_transition_kernel(%arg0: i32, %arg1: memref<128x256xf32, #tpu.memory_space<vmem>>, %arg2: memref<1x256xf32, #tpu.memory_space<vmem>>, %arg3: memref<1x256xf32, #tpu.memory_space<vmem>>, %arg4: memref<256x128xf32, #tpu.memory_space<vmem>>, %arg5: memref<128x128xf32, #tpu.memory_space<vmem>>) attributes {dimension_semantics = [#tpu.dimension_semantics<parallel>], iteration_bounds = array<i64: 1>, scalar_prefetch = 0 : i64, scratch_operands = 0 : i64, tpu.core_type = #tpu.core_type<tc>, window_params = [{transform_indices = @transform_0, window_bounds = array<i64: 128, 256>}, {pipeline_mode = #tpu.pipeline_mode<synchronous>, transform_indices = @transform_1, window_bounds = array<i64: 1, 256>}, {pipeline_mode = #tpu.pipeline_mode<synchronous>, transform_indices = @transform_2, window_bounds = array<i64: 1, 256>}, {pipeline_mode = #tpu.pipeline_mode<synchronous>, transform_indices = @transform_3, window_bounds = array<i64: 256, 128>}, {transform_indices = @transform_4, window_bounds = array<i64: 128, 128>}]} {
    %c0 = arith.constant 0 : index
    %c0_0 = arith.constant 0 : index
    %0 = vector.load %arg1[%c0, %c0_0] : memref<128x256xf32, #tpu.memory_space<vmem>>, vector<128x256xf32>
    %c0_1 = arith.constant 0 : index
    %c0_2 = arith.constant 0 : index
    %1 = vector.load %arg2[%c0_1, %c0_2] : memref<1x256xf32, #tpu.memory_space<vmem>>, vector<1x256xf32>
    %2 = vector.broadcast %1 : vector<1x256xf32> to vector<128x256xf32>
    %3 = arith.mulf %0, %2 : vector<128x256xf32>
    %c0_3 = arith.constant 0 : index
    %c0_4 = arith.constant 0 : index
    %4 = vector.load %arg3[%c0_3, %c0_4] : memref<1x256xf32, #tpu.memory_space<vmem>>, vector<1x256xf32>
    %5 = vector.broadcast %4 : vector<1x256xf32> to vector<128x256xf32>
    %6 = arith.addf %3, %5 : vector<128x256xf32>
    %cst = arith.constant 0.000000e+00 : f32
    %7 = vector.broadcast %cst : f32 to vector<128x256xf32>
    %8 = arith.maximumf %6, %7 : vector<128x256xf32>
    %c0_5 = arith.constant 0 : index
    %c0_6 = arith.constant 0 : index
    %9 = vector.load %arg4[%c0_5, %c0_6] : memref<256x128xf32, #tpu.memory_space<vmem>>, vector<256x128xf32>
    %cst_7 = arith.constant dense<0.000000e+00> : vector<128x128xf32>
    %10 = tpu.matmul %8, %9, %cst_7 {dimension_numbers = #tpu.dot_dimension_numbers<[1], [0], [0], [1], [0, 0, 1, 1], [], []>} : vector<128x256xf32>, vector<256x128xf32>, vector<128x128xf32> -> vector<128x128xf32>
    %c0_8 = arith.constant 0 : index
    %c0_9 = arith.constant 0 : index
    %11 = vector.load %arg5[%c0_8, %c0_9] : memref<128x128xf32, #tpu.memory_space<vmem>>, vector<128x128xf32>
    tpu.vector_store %arg5[%c0_8, %c0_9], %10 {strides = array<i32>} : memref<128x128xf32, #tpu.memory_space<vmem>>, vector<128x128xf32>,
    return
  }
  func.func @transform_0(%arg0: i32) -> (i32, i32) {
    %c0_i32 = arith.constant 0 : i32
    %c0_i32_0 = arith.constant 0 : i32
    return %arg0, %c0_i32 : i32, i32
  }
  func.func @transform_1(%arg0: i32) -> (i32, i32) {
    %c0_i32 = arith.constant 0 : i32
    %c0_i32_0 = arith.constant 0 : i32
    %c0_i32_1 = arith.constant 0 : i32
    return %c0_i32, %c0_i32_0 : i32, i32
  }
  func.func @transform_2(%arg0: i32) -> (i32, i32) {
    %c0_i32 = arith.constant 0 : i32
    %c0_i32_0 = arith.constant 0 : i32
    %c0_i32_1 = arith.constant 0 : i32
    return %c0_i32, %c0_i32_0 : i32, i32
  }
  func.func @transform_3(%arg0: i32) -> (i32, i32) {
    %c0_i32 = arith.constant 0 : i32
    %c0_i32_0 = arith.constant 0 : i32
    %c0_i32_1 = arith.constant 0 : i32
    return %c0_i32, %c0_i32_0 : i32, i32
  }
  func.func @transform_4(%arg0: i32) -> (i32, i32) {
    %c0_i32 = arith.constant 0 : i32
    %c0_i32_0 = arith.constant 0 : i32
    return %arg0, %c0_i32 : i32, i32
  }
}

</mosaic_0001>

<bundles_post_ra>
// kernel: tile.13
= control target key start
LH: loop header
LB: loop body
LE: loop exit
PB: predicated region body
PF: predicated region fallthrough
CT: control target
= control target key end

     0   :  { %s22_s0 = inlined_call_operand.vmem [shape: f32[128], index: 0, kind: input, shape index: {}]   ;;  %s23_s1 = inlined_call_operand.vmem [shape: f32[2,128], index: 1, kind: output, shape index: {}]  }
   0x1   :  { %v4_v0 = vld [vmem:[%s22_s0] ss:$0 sm:$0xff] }
   0x2   :  { %5 = vst [vmem:[%s23_s1] sm:$0x3] %v4_v0 }

// kernel: _lambda_.1
= control target key start
LH: loop header
LB: loop body
LE: loop exit
PB: predicated region body
PF: predicated region fallthrough
CT: control target
= control target key end

     0   :  { %v52_v7 = vlaneseq  ;;  %s817_s0 = inlined_call_operand.vmem [shape: f32[128,256], index: 0, kind: input, shape index: {}]   ;;  %s818_s1 = inlined_call_operand.vmem [shape: f32[1,256], index: 1, kind: input, shape index: {}]   ;;  %s819_s2 = inlined_call_operand.vmem [shape: f32[1,256], index: 2, kind: input, shape index: {}]   ;;  %s820_s3 = inlined_call_operand.vmem [shape: f32[256,128], index: 3, kind: input, shape index: {}]   ;;  %s821_s4 = inlined_call_operand.hbm [shape: f32[128,128], index: 4, kind: output, shape index: {}]  }
   0x1   :  { %v201_v0 = vld [vmem:[%s820_s3 + $0xf8] sm:$0xff]  ;;  %v200_v2 = vld [vmem:[%s820_s3 + $0xf0] sm:$0xff]  ;;  %v199_v4 = vld [vmem:[%s820_s3 + $0xe8] sm:$0xff] }
   0x2   :  { %v185_v1 = vld [vmem:[%s820_s3 + $0x78] sm:$0xff]  ;;  %379 = vmatprep.subr.mxu0 %v201_v0  ;;  %459 = vmatprep.subr.mxu1 %v201_v0  ;;  %v184_v3 = vld [vmem:[%s820_s3 + $0x70] sm:$0xff]  ;;  %v183_v5 = vld [vmem:[%s820_s3 + $0x68] sm:$0xff]  ;;  %v53_v12 = vshrl.u32 %v52_v7, 7 }
   0x3   :  { %380 = vmatpush3.msra.mxu0 %v185_v1  ;;  %475 = vmatpush3.msra.mxu1 %v185_v1  ;;  %v198_v6 = vld [vmem:[%s820_s3 + $0xe0] sm:$0xff]  ;;  %v197_v9 = vld [vmem:[%s820_s3 + $0xd8] sm:$0xff]  ;;  %v196_v11 = vld [vmem:[%s820_s3 + $0xd0] sm:$0xff] }
   0x4   :  { %381 = vmatprep.subr.mxu0 %v200_v2  ;;  %460 = vmatprep.subr.mxu1 %v200_v2  ;;  %v182_v8 = vld [vmem:[%s820_s3 + $0x60] sm:$0xff]  ;;  %v181_v10 = vld [vmem:[%s820_s3 + $0x58] sm:$0xff]  ;;  %v180_v13 = vld [vmem:[%s820_s3 + $0x50] sm:$0xff]  ;;  %v58_v17 = vsub.s32 1, %v53_v12  ;;  %v54_v20 = vsub.s32 0, %v53_v12 }
   0x5   :  { %382 = vmatpush3.msra.mxu0 %v184_v3  ;;  %476 = vmatpush3.msra.mxu1 %v184_v3  ;;  %v195_v14 = vld [vmem:[%s820_s3 + $0xc8] sm:$0xff]  ;;  %v194_v16 = vld [vmem:[%s820_s3 + $0xc0] sm:$0xff]  ;;  %v193_v21 = vld [vmem:[%s820_s3 + $0xb8] sm:$0xff] }
   0x6   :  { %383 = vmatprep.subr.mxu0 %v199_v4  ;;  %461 = vmatprep.subr.mxu1 %v199_v4  ;;  %v179_v15 = vld [vmem:[%s820_s3 + $0x48] sm:$0xff]  ;;  %v178_v18 = vld [vmem:[%s820_s3 + $0x40] sm:$0xff]  ;;  %v177_v22 = vld [vmem:[%s820_s3 + $0x38] sm:$0xff] }
   0x7   :  { %384 = vmatpush3.msra.mxu0 %v183_v5  ;;  %477 = vmatpush3.msra.mxu1 %v183_v5  ;;  %v50_v19 = vld [vmem:[%s818_s1] sm:$0x3]  ;;  %v192_v23 = vld [vmem:[%s820_s3 + $0xb0] sm:$0xff]  ;;  %v19_v26 = vld [vmem:[%s817_s0 + $0x8] sm:$0xff] }
   0x8   :  { %385 = vmatprep.subr.mxu0 %v198_v6  ;;  %462 = vmatprep.subr.mxu1 %v198_v6  ;;  %v176_v24 = vld [vmem:[%s820_s3 + $0x30] sm:$0xff]  ;;  %v607_v25 = vrot.slane %v50_v19, %v58_v17  ;;  %v612_v27 = vrot.slane %v50_v19, %v54_v20  ;;  %v94_v28 = vld [vmem:[%s819_s2] sm:$0x3]  ;;  %v35_v29 = vld [vmem:[%s817_s0 + $0x88] sm:$0xff] }
   0x9   :  { %386 = vmatpush3.msra.mxu0 %v182_v8  ;;  %478 = vmatpush3.msra.mxu1 %v182_v8  ;;  %v191_v30 = vld [vmem:[%s820_s3 + $0xa8] sm:$0xff]  ;;  %v18_v31 = vld [vmem:[%s817_s0] sm:$0xff]  ;;  %v636_v36 = vrot.slane %v94_v28, %v58_v17  ;;  %v21_v38 = vld [vmem:[%s817_s0 + $0x18] sm:$0xff]  ;;  %v651_v42 = vrot.slane %v94_v28, %v54_v20 }
   0xa   :  { %387 = vmatprep.subr.mxu0 %v197_v9  ;;  %463 = vmatprep.subr.mxu1 %v197_v9  ;;  %v175_v32 = vld [vmem:[%s820_s3 + $0x28] sm:$0xff]  ;;  %v34_v33 = vld [vmem:[%s817_s0 + $0x80] sm:$0xff]  ;;  %v63_v35 = vmul.f32 %v607_v25, %v19_v26  ;;  %v79_v37 = vmul.f32 %v607_v25, %v35_v29  ;;  %v37_v39 = vld [vmem:[%s817_s0 + $0x98] sm:$0xff]  ;;  %v62_v43 = vmul.f32 %v612_v27, %v18_v31 }
   0xb   :  { %388 = vmatpush3.msra.mxu0 %v181_v10  ;;  %479 = vmatpush3.msra.mxu1 %v181_v10  ;;  %v190_v34 = vld [vmem:[%s820_s3 + $0xa0] sm:$0xff]  ;;  %v189_v41 = vld [vmem:[%s820_s3 + $0x98] sm:$0xff]  ;;  %v78_v44 = vmul.f32 %v612_v27, %v34_v33  ;;  %v20_v45 = vld [vmem:[%s817_s0 + $0x10] sm:$0xff] }
   0xc   :  { %389 = vmatprep.subr.mxu0 %v196_v11  ;;  %464 = vmatprep.subr.mxu1 %v196_v11  ;;  %v174_v40 = vld [vmem:[%s820_s3 + $0x20] sm:$0xff]  ;;  %v36_v46 = vld [vmem:[%s817_s0 + $0x90] sm:$0xff] }
   0xd   :  { %390 = vmatpush3.msra.mxu0 %v180_v13  ;;  %480 = vmatpush3.msra.mxu1 %v180_v13 }
   0xe   :  { %391 = vmatprep.subr.mxu0 %v195_v14  ;;  %465 = vmatprep.subr.mxu1 %v195_v14 }
   0xf   :  { %392 = vmatpush3.msra.mxu0 %v179_v15  ;;  %481 = vmatpush3.msra.mxu1 %v179_v15 }
  0x10   :  { %393 = vmatprep.subr.mxu0 %v194_v16  ;;  %466 = vmatprep.subr.mxu1 %v194_v16 }
  0x11   :  { %394 = vmatpush3.msra.mxu0 %v178_v18  ;;  %482 = vmatpush3.msra.mxu1 %v178_v18 }
  0x12   :  { %395 = vmatprep.subr.mxu0 %v193_v21  ;;  %467 = vmatprep.subr.mxu1 %v193_v21 }
  0x13   :  { %396 = vmatpush3.msra.mxu0 %v177_v22  ;;  %483 = vmatpush3.msra.mxu1 %v177_v22 }
  0x14   :  { %397 = vmatprep.subr.mxu0 %v192_v23  ;;  %468 = vmatprep.subr.mxu1 %v192_v23 }
  0x15   :  { %398 = vmatpush3.msra.mxu0 %v176_v24  ;;  %484 = vmatpush3.msra.mxu1 %v176_v24 }
  0x16   :  { %399 = vmatprep.subr.mxu0 %v191_v30  ;;  %469 = vmatprep.subr.mxu1 %v191_v30 }
  0x17   :  { %400 = vmatpush3.msra.mxu0 %v175_v32  ;;  %485 = vmatpush3.msra.mxu1 %v175_v32 }
  0x18   :  { %9 = vsyncpa [#allocation3], 0  ;;  %401 = vmatprep.subr.mxu0 %v190_v34  ;;  %470 = vmatprep.subr.mxu1 %v190_v34  ;;  %v173_v47 = vld [vmem:[%s820_s3 + $0x18] sm:$0xff]  ;;  %v65_v48 = vmul.f32 %v607_v25, %v21_v38  ;;  %v81_v49 = vmul.f32 %v607_v25, %v37_v39  ;;  %v23_v50 = vld [vmem:[%s817_s0 + $0x28] sm:$0xff]  ;;  %v107_v52 = vadd.f32 %v636_v36, %v63_v35 }
  0x19   :  { %402 = vmatpush3.msra.mxu0 %v174_v40  ;;  %486 = vmatpush3.msra.mxu1 %v174_v40  ;;  %v188_v51 = vld [vmem:[%s820_s3 + $0x90] sm:$0xff]  ;;  %v123_v53 = vadd.f32 %v636_v36, %v79_v37  ;;  %v39_v54 = vld [vmem:[%s817_s0 + $0xa8] sm:$0xff]  ;;  %v106_v56 = vadd.f32 %v651_v42, %v62_v43  ;;  %v64_v57 = vmul.f32 %v612_v27, %v20_v45  ;;  %v22_v62 = vld [vmem:[%s817_s0 + $0x20] sm:$0xff] }
  0x1a   :  { %403 = vmatprep.subr.mxu0 %v189_v41  ;;  %471 = vmatprep.subr.mxu1 %v189_v41  ;;  %v172_v55 = vld [vmem:[%s820_s3 + $0x10] sm:$0xff]  ;;  %v80_v58 = vmul.f32 %v612_v27, %v36_v46  ;;  %v187_v59 = vld [vmem:[%s820_s3 + $0x88] sm:$0xff]  ;;  %v122_v60 = vadd.f32 %v651_v42, %v78_v44  ;;  %v67_v61 = vmul.f32 %v607_v25, %v23_v50  ;;  %v38_v3 = vld [vmem:[%s817_s0 + $0xa0] sm:$0xff]  ;;  %v139_v6 = vmax.f32 %v107_v52, 0.0 }
  0x1b   :  { %404 = vmatpush3.msra.mxu0 %v173_v47  ;;  %487 = vmatpush3.msra.mxu1 %v173_v47  ;;  %v171_v63 = vld [vmem:[%s820_s3 + $0x8] sm:$0xff]  ;;  %v109_v0 = vadd.f32 %v636_v36, %v65_v48  ;;  %v125_v1 = vadd.f32 %v636_v36, %v81_v49  ;;  %v83_v2 = vmul.f32 %v607_v25, %v39_v54  ;;  %v25_v4 = vld [vmem:[%s817_s0 + $0x38] sm:$0xff]  ;;  %v186_v5 = vld [vmem:[%s820_s3 + $0x80] sm:$0xff]  ;;  %v155_v7 = vmax.f32 %v123_v53, 0.0 }
  0x1c   :  { %405 = vmatprep.subr.mxu0 %v188_v51  ;;  %472 = vmatprep.subr.mxu1 %v188_v51  ;;  %v41_v8 = vld [vmem:[%s817_s0 + $0xb8] sm:$0xff]  ;;  %v170_v9 = vld [vmem:[%s820_s3] sm:$0xff]  ;;  %v138_v10 = vmax.f32 %v106_v56, 0.0  ;;  %v108_v11 = vadd.f32 %v651_v42, %v64_v57  ;;  %v124_v12 = vadd.f32 %v651_v42, %v80_v58  ;;  %v66_v13 = vmul.f32 %v612_v27, %v22_v62  ;;  %v24_v18 = vld [vmem:[%s817_s0 + $0x30] sm:$0xff] }
  0x1d   :  { %406 = vmatpush3.msra.mxu0 %v172_v55  ;;  %488 = vmatpush3.msra.mxu1 %v172_v55  ;;  %v154_v14 = vmax.f32 %v122_v60, 0.0  ;;  %v111_v15 = vadd.f32 %v636_v36, %v67_v61  ;;  %v82_v16 = vmul.f32 %v612_v27, %v38_v3  ;;  %v69_v17 = vmul.f32 %v607_v25, %v25_v4  ;;  %v40_v23 = vld [vmem:[%s817_s0 + $0xb0] sm:$0xff]  ;;  %v27_v24 = vld [vmem:[%s817_s0 + $0x48] sm:$0xff]  ;;  %v26_v37 = vld [vmem:[%s817_s0 + $0x40] sm:$0xff] }
  0x1e   :  { %407 = vmatprep.subr.mxu0 %v187_v59  ;;  %473 = vmatprep.subr.mxu1 %v187_v59  ;;  %v141_v19 = vmax.f32 %v109_v0, 0.0  ;;  %v157_v20 = vmax.f32 %v125_v1, 0.0  ;;  %v127_v21 = vadd.f32 %v636_v36, %v83_v2  ;;  %v85_v22 = vmul.f32 %v607_v25, %v41_v8  ;;  %v43_v26 = vld [vmem:[%s817_s0 + $0xc8] sm:$0xff]  ;;  %v42_v38 = vld [vmem:[%s817_s0 + $0xc0] sm:$0xff]  ;;  %v29_v44 = vld [vmem:[%s817_s0 + $0x58] sm:$0xff] }
  0x1f   :  { %408 = vmatpush3.msra.mxu0 %v171_v63  ;;  %489 = vmatpush3.msra.mxu1 %v171_v63  ;;  %v140_v28 = vmax.f32 %v108_v11, 0.0  ;;  %v156_v29 = vmax.f32 %v124_v12, 0.0  ;;  %v110_v30 = vadd.f32 %v651_v42, %v66_v13  ;;  %v68_v31 = vmul.f32 %v612_v27, %v24_v18  ;;  %v45_v45 = vld [vmem:[%s817_s0 + $0xd8] sm:$0xff]  ;;  %v28_v54 = vld [vmem:[%s817_s0 + $0x50] sm:$0xff]  ;;  %v31_v60 = vld [vmem:[%s817_s0 + $0x68] sm:$0xff] }
  0x20   :  { %409 = vmatprep.subr.mxu0 %v186_v5  ;;  %474 = vmatprep.subr.mxu1 %v186_v5  ;;  %v143_v32 = vmax.f32 %v111_v15, 0.0  ;;  %v126_v33 = vadd.f32 %v651_v42, %v82_v16  ;;  %v113_v34 = vadd.f32 %v636_v36, %v69_v17  ;;  %v84_v35 = vmul.f32 %v612_v27, %v40_v23  ;;  %v44_v59 = vld [vmem:[%s817_s0 + $0xd0] sm:$0xff]  ;;  %v47_v61 = vld [vmem:[%s817_s0 + $0xe8] sm:$0xff]  ;;  %v46_v11 = vld [vmem:[%s817_s0 + $0xe0] sm:$0xff] }
  0x21   :  { %410 = vmatpush3.msra.mxu0 %v170_v9  ;;  %490 = vmatpush3.msra.mxu1 %v170_v9  ;;  %v159_v39 = vmax.f32 %v127_v21, 0.0  ;;  %v129_v40 = vadd.f32 %v636_v36, %v85_v22  ;;  %v71_v41 = vmul.f32 %v607_v25, %v27_v24  ;;  %v87_v43 = vmul.f32 %v607_v25, %v43_v26  ;;  %v33_v12 = vld [vmem:[%s817_s0 + $0x78] sm:$0xff] }
  0x22   :  { %266 = vmatprep.mubr.f32.mxu0 %v139_v6  ;;  %306 = vmatprep.mubr.f32.mxu1 %v155_v7  ;;  %v142_v46 = vmax.f32 %v110_v30, 0.0  ;;  %v112_v47 = vadd.f32 %v651_v42, %v68_v31  ;;  %v70_v48 = vmul.f32 %v612_v27, %v26_v37  ;;  %v86_v49 = vmul.f32 %v612_v27, %v42_v38  ;;  %v30_v6 = vld [vmem:[%s817_s0 + $0x60] sm:$0xff]  ;;  %v49_v13 = vld [vmem:[%s817_s0 + $0xf8] sm:$0xff] }
  0x23   :  { %267 = vmatmul.mubr.f32.vlgmr.msra.gmra.mxu0 %v138_v10  ;;  %307 = vmatmul.mubr.f32.vlgmr.msra.gmra.mxu1 %v154_v14  ;;  %v158_v50 = vmax.f32 %v126_v33, 0.0  ;;  %v145_v51 = vmax.f32 %v113_v34, 0.0  ;;  %v128_v52 = vadd.f32 %v651_v42, %v84_v35  ;;  %v73_v53 = vmul.f32 %v607_v25, %v29_v44 }
  0x24   :  { %271 = vmatprep.mubr.f32.mxu0 %v141_v19  ;;  %311 = vmatprep.mubr.f32.mxu1 %v157_v20  ;;  %v161_v55 = vmax.f32 %v129_v40, 0.0  ;;  %v115_v56 = vadd.f32 %v636_v36, %v71_v41  ;;  %v131_v57 = vadd.f32 %v636_v36, %v87_v43  ;;  %v89_v58 = vmul.f32 %v607_v25, %v45_v45 }
  0x25   :  { %v144_v62 = vmax.f32 %v112_v47, 0.0  ;;  %v114_v63 = vadd.f32 %v651_v42, %v70_v48  ;;  %v130_v0 = vadd.f32 %v651_v42, %v86_v49  ;;  %v72_v1 = vmul.f32 %v612_v27, %v28_v54 }
  0x26   :  { %v160_v2 = vmax.f32 %v128_v52, 0.0  ;;  %v117_v3 = vadd.f32 %v636_v36, %v73_v53  ;;  %v88_v4 = vmul.f32 %v612_v27, %v44_v59  ;;  %v75_v5 = vmul.f32 %v607_v25, %v31_v60 }
  0x27   :  { %272 = vmatmul.mubr.f32.gmra.mxu0 %v140_v28  ;;  %312 = vmatmul.mubr.f32.gmra.mxu1 %v156_v29  ;;  %v147_v7 = vmax.f32 %v115_v56, 0.0  ;;  %v163_v8 = vmax.f32 %v131_v57, 0.0  ;;  %v133_v9 = vadd.f32 %v636_v36, %v89_v58  ;;  %v91_v10 = vmul.f32 %v607_v25, %v47_v61  ;;  %v32_v28 = vld [vmem:[%s817_s0 + $0x70] sm:$0xff] }
  0x28   :  { %276 = vmatprep.mubr.f32.mxu0 %v143_v32  ;;  %316 = vmatprep.mubr.f32.mxu1 %v159_v39  ;;  %v146_v14 = vmax.f32 %v114_v63, 0.0  ;;  %v162_v15 = vmax.f32 %v130_v0, 0.0  ;;  %v116_v16 = vadd.f32 %v651_v42, %v72_v1  ;;  %v74_v17 = vmul.f32 %v612_v27, %v30_v6  ;;  %v48_v29 = vld [vmem:[%s817_s0 + $0xf0] sm:$0xff]  ;;  %s516_s0 = smov [#allocation2]  }
  0x29   :  { %v149_v18 = vmax.f32 %v117_v3, 0.0  ;;  %v132_v19 = vadd.f32 %v651_v42, %v88_v4  ;;  %v119_v20 = vadd.f32 %v636_v36, %v75_v5  ;;  %v90_v21 = vmul.f32 %v612_v27, %v46_v11  ;;  %s368_s8 = sshll.u32 %s516_s0, 4  ;;  %s369_s8 = int_to_ptr.vmem [resolvable:$true] %s368_s8 }
  0x2a   :  { %v165_v22 = vmax.f32 %v133_v9, 0.0  ;;  %v135_v23 = vadd.f32 %v636_v36, %v91_v10  ;;  %v77_v24 = vmul.f32 %v607_v25, %v33_v12  ;;  %v93_v26 = vmul.f32 %v607_v25, %v49_v13  ;;  %s494_s9 = scalar_lea.vmem %s369_s8, 2048  ;;  %p499_p1 = scmp.lt.s32.totalorder %s369_s8, %s369_s8 }
  0x2b   :  { %277 = vmatmul.mubr.f32.gmra.mxu0 %v142_v46  ;;  %317 = vmatmul.mubr.f32.gmra.mxu1 %v158_v50  ;;  %v148_v30 = vmax.f32 %v116_v16, 0.0  ;;  %v118_v31 = vadd.f32 %v651_v42, %v74_v17  ;;  %v164_v32 = vmax.f32 %v132_v19, 0.0  ;;  %v134_v33 = vadd.f32 %v651_v42, %v90_v21  ;;  %p495_p0 = scmp.ne.s32.totalorder %s369_s8, %s494_s9  ;;  %p500_p2 = scmp.lt.s32.totalorder %s494_s9, %s494_s9 }
  0x2c   :  { %281 = vmatprep.mubr.f32.mxu0 %v145_v51  ;;  %321 = vmatprep.mubr.f32.mxu1 %v161_v55  ;;  %v76_v34 = vmul.f32 %v612_v27, %v32_v28  ;;  %v92_v25 = vmul.f32 %v612_v27, %v48_v29  ;;  %v151_v35 = vmax.f32 %v119_v20, 0.0  ;;  %v167_v37 = vmax.f32 %v135_v23, 0.0 }
  0x2d   :  { %v121_v38 = vadd.f32 %v636_v36, %v77_v24  ;;  %v137_v39 = vadd.f32 %v636_v36, %v93_v26  ;;  %v150_v40 = vmax.f32 %v118_v31, 0.0  ;;  %v166_v41 = vmax.f32 %v134_v33, 0.0  ;;  %p501_p3 = por %p500_p2, %p499_p1 }
  0x2e   :  { %v120_v43 = vadd.f32 %v651_v42, %v76_v34  ;;  %v136_v44 = vadd.f32 %v651_v42, %v92_v25 }
  0x2f   :  { %282 = vmatmul.mubr.f32.gmra.mxu0 %v144_v62  ;;  %322 = vmatmul.mubr.f32.gmra.mxu1 %v160_v2  ;;  %v153_v45 = vmax.f32 %v121_v38, 0.0  ;;  %v169_v27 = vmax.f32 %v137_v39, 0.0  ;;  %p502_p4 = pnand %p501_p3, %p495_p0 }
  0x30   :  { %286 = vmatprep.mubr.f32.mxu0 %v147_v7  ;;  %326 = vmatprep.mubr.f32.mxu1 %v163_v8  ;;  %v152_v46 = vmax.f32 %v120_v43, 0.0  ;;  %v168_v47 = vmax.f32 %v136_v44, 0.0 }
  0x33   :  { %287 = vmatmul.mubr.f32.gmra.mxu0 %v146_v14  ;;  %327 = vmatmul.mubr.f32.gmra.mxu1 %v162_v15 }
  0x34   :  { %291 = vmatprep.mubr.f32.mxu0 %v149_v18  ;;  %331 = vmatprep.mubr.f32.mxu1 %v165_v22 }
  0x37   :  { %292 = vmatmul.mubr.f32.gmra.mxu0 %v148_v30  ;;  %332 = vmatmul.mubr.f32.gmra.mxu1 %v164_v32 }
  0x38   :  { %296 = vmatprep.mubr.f32.mxu0 %v151_v35  ;;  %336 = vmatprep.mubr.f32.mxu1 %v167_v37 }
  0x3b   :  { %297 = vmatmul.mubr.f32.gmra.mxu0 %v150_v40  ;;  %337 = vmatmul.mubr.f32.gmra.mxu1 %v166_v41 }
  0x3c   :  { %301 = vmatprep.mubr.f32.mxu0 %v153_v45  ;;  %341 = vmatprep.mubr.f32.mxu1 %v169_v27 }
  0x3f   :  { %302 = vmatmul.mubr.f32.gmra.mxu0 %v152_v46  ;;  %342 = vmatmul.mubr.f32.gmra.mxu1 %v168_v47 }
  0xe3   :  { %v411_v36 = vpop.f32.mrf.mxu0  ;;  %v435_v48 = vpop.f32.mrf.mxu1 }
  0xe5   :  { %v412_v49 = vpop.f32.mrf.mxu0  ;;  %v436_v50 = vpop.f32.mrf.mxu1 }
  0xe6   :  { %v413_v51 = vadd.f32 %v412_v49, %v411_v36  ;;  %v437_v52 = vadd.f32 %v436_v50, %v435_v48 }
  0xe7   :  { %v414_v53 = vpop.f32.mrf.mxu0  ;;  %v438_v42 = vpop.f32.mrf.mxu1 }
  0xe8   :  { %347 = vst [vmem:[#allocation2] sm:$0xff] %v413_v51  ;;  %355 = vst [vmem:[#allocation2 + $0x40] sm:$0xff] %v437_v52 }
  0xe9   :  { %v415_v54 = vpop.f32.mrf.mxu0  ;;  %v439_v55 = vpop.f32.mrf.mxu1 }
  0xea   :  { %v416_v56 = vadd.f32 %v415_v54, %v414_v53  ;;  %v440_v57 = vadd.f32 %v439_v55, %v438_v42 }
  0xeb   :  { %v417_v58 = vpop.f32.mrf.mxu0  ;;  %v441_v59 = vpop.f32.mrf.mxu1 }
  0xec   :  { %348 = vst [vmem:[#allocation2 + $0x8] sm:$0xff] %v416_v56  ;;  %356 = vst [vmem:[#allocation2 + $0x48] sm:$0xff] %v440_v57 }
  0xed   :  { %v418_v60 = vpop.f32.mrf.mxu0  ;;  %v442_v61 = vpop.f32.mrf.mxu1 }
  0xee   :  { %v419_v62 = vadd.f32 %v418_v60, %v417_v58  ;;  %v443_v63 = vadd.f32 %v442_v61, %v441_v59 }
  0xef   :  { %v420_v0 = vpop.f32.mrf.mxu0  ;;  %v444_v1 = vpop.f32.mrf.mxu1 }
  0xf0   :  { %349 = vst [vmem:[#allocation2 + $0x10] sm:$0xff] %v419_v62  ;;  %357 = vst [vmem:[#allocation2 + $0x50] sm:$0xff] %v443_v63 }
  0xf1   :  { %v421_v2 = vpop.f32.mrf.mxu0  ;;  %v445_v3 = vpop.f32.mrf.mxu1 }
  0xf2   :  { %v422_v4 = vadd.f32 %v421_v2, %v420_v0  ;;  %v446_v5 = vadd.f32 %v445_v3, %v444_v1 }
  0xf3   :  { %v423_v6 = vpop.f32.mrf.mxu0  ;;  %v447_v7 = vpop.f32.mrf.mxu1 }
  0xf4   :  { %350 = vst [vmem:[#allocation2 + $0x18] sm:$0xff] %v422_v4  ;;  %358 = vst [vmem:[#allocation2 + $0x58] sm:$0xff] %v446_v5 }
  0xf5   :  { %v424_v8 = vpop.f32.mrf.mxu0  ;;  %v448_v9 = vpop.f32.mrf.mxu1 }
  0xf6   :  { %v425_v10 = vadd.f32 %v424_v8, %v423_v6  ;;  %v449_v11 = vadd.f32 %v448_v9, %v447_v7 }
  0xf7   :  { %v426_v12 = vpop.f32.mrf.mxu0  ;;  %v450_v13 = vpop.f32.mrf.mxu1 }
  0xf8   :  { %351 = vst [vmem:[#allocation2 + $0x20] sm:$0xff] %v425_v10  ;;  %359 = vst [vmem:[#allocation2 + $0x60] sm:$0xff] %v449_v11 }
  0xf9   :  { %v427_v14 = vpop.f32.mrf.mxu0  ;;  %v451_v15 = vpop.f32.mrf.mxu1 }
  0xfa   :  { %v428_v16 = vadd.f32 %v427_v14, %v426_v12  ;;  %v452_v17 = vadd.f32 %v451_v15, %v450_v13 }
  0xfb   :  { %v429_v18 = vpop.f32.mrf.mxu0  ;;  %v453_v19 = vpop.f32.mrf.mxu1 }
  0xfc   :  { %352 = vst [vmem:[#allocation2 + $0x28] sm:$0xff] %v428_v16  ;;  %360 = vst [vmem:[#allocation2 + $0x68] sm:$0xff] %v452_v17 }
  0xfd   :  { %v430_v20 = vpop.f32.mrf.mxu0  ;;  %v454_v21 = vpop.f32.mrf.mxu1 }
  0xfe   :  { %v431_v22 = vadd.f32 %v430_v20, %v429_v18  ;;  %v455_v23 = vadd.f32 %v454_v21, %v453_v19 }
  0xff   :  { %v432_v24 = vpop.f32.mrf.mxu0  ;;  %v456_v26 = vpop.f32.mrf.mxu1 }
 0x100   :  { %353 = vst [vmem:[#allocation2 + $0x30] sm:$0xff] %v431_v22  ;;  %361 = vst [vmem:[#allocation2 + $0x70] sm:$0xff] %v455_v23 }
 0x101   :  { %v433_v28 = vpop.f32.mrf.mxu0  ;;  %v457_v29 = vpop.f32.mrf.mxu1 }
 0x102   :  { %v434_v30 = vadd.f32 %v433_v28, %v432_v24  ;;  %v458_v31 = vadd.f32 %v457_v29, %v456_v26 }
 0x104   :  { %354 = vst [vmem:[#allocation2 + $0x38] sm:$0xff] %v434_v30  ;;  %362 = vst [vmem:[#allocation2 + $0x78] sm:$0xff] %v458_v31 }
 0x105   :  { %505 = shalt.err (!%p502_p4)
}
 0x106   :  { %s517_s10 = smov 128   ;;  %s518_s11 = smov 8  }
 0x107   :  { %374 = dma.vmem_to_hbm [thread:$0]  %s369_s8, 2048, %s821_s4, [#allocation3], %s517_s10, %s517_s10, %s518_s11  }
 0x108   :  { %514 = dma.done.wait [#allocation3], 2048  }
 0x109   :  { %515 = vsyncadd [#allocation3], 4294965248 }
 0x10a   :  { %378 = vsyncpa [#allocation3], 1 }

</bundles_post_ra>
